<compile_context>
chip_gen: v5e
topology: v5e:2x2
jax: 0.10.0
libtpu: 0.0.40
codegen_flags: <defaults>
</compile_context>

<pallas_src>
import functools

import jax
import jax.numpy as jnp
from jax.experimental import pallas as pl
from jax.experimental.pallas import tpu as pltpu


def _round_up(x, m):
    return ((x + m - 1) // m) * m


def _conv1d_kernel(*refs, ksize, dilation, stride, groups, c_chan, c_in_g,
                   has_halo, depthwise, per_tap):
    """One grid step = (batch b, L_out tile lt, C_out tile co).

    refs (in order):
      xa_ref : (1, CHAN, TL)        main input window for this L tile
      xh_ref : (1, CHAN, HALO_BLK)  start of the next L tile (only if has_halo)
      w_ref  : (TCO, W_COLS)        weight tile, contraction dim last
      b_ref  : (TCO, 1)
      o_ref  : (1, TCO, TL)
    """
    if has_halo:
        xa_ref, xh_ref, w_ref, b_ref, o_ref = refs
    else:
        xa_ref, w_ref, b_ref, o_ref = refs
        xh_ref = None

    xa = xa_ref[0]                                # (CHAN, TL), native dtype
    xh = xh_ref[0] if has_halo else None          # (CHAN, HALO_BLK)

    def tap(k):
        # Contiguous lane slice per kernel tap (phase layout removes the
        # stride); only taps that spill past the tile append <= max_q halo
        # lanes -- no full-window concat/copy per step.
        off = k * dilation
        r, q = off % stride, off // stride
        lo = r * c_chan
        main = xa[lo:lo + c_chan, :]
        if q == 0:
            return main
        return jnp.concatenate([main[:, q:], xh[lo:lo + c_chan, :q]], axis=-1)

    w = w_ref[...]
    tco, tl = o_ref.shape[1], o_ref.shape[2]

    if depthwise:
        # groups == C_in == C_out: a (1 x TL) "matmul" per channel wastes the
        # MXU -- VPU broadcast MAC; C_out is tiled so acc stays vreg-resident.
        acc = jnp.zeros((tco, tl), jnp.float32)
        for k in range(ksize):
            acc = acc + (w[:, k:k + 1].astype(jnp.float32) *
                         tap(k).astype(jnp.float32))
    elif groups == 1:
        if per_tap:
            # Wide channels: K accumulated matmuls, no im2col slab duplication.
            acc = jnp.zeros((tco, tl), jnp.float32)
            for k in range(ksize):
                acc = acc + jnp.dot(w[:, k * c_chan:(k + 1) * c_chan], tap(k),
                                    preferred_element_type=jnp.float32)
        else:
            # Small C_in: one wide MXU matmul over the k-major im2col slab.
            slab = jnp.concatenate([tap(k) for k in range(ksize)], axis=0)
            acc = jnp.dot(w, slab, preferred_element_type=jnp.float32)
    else:
        # Grouped (non-depthwise).  All groups live in one C_out tile.
        # TODO(synk): map groups onto the co grid axis for large group counts
        # (each per-group contraction here is only K*C_in_g deep).
        cog = tco // groups
        outs = []
        for g in range(groups):
            slab = jnp.concatenate(
                [tap(k)[g * c_in_g:(g + 1) * c_in_g, :] for k in range(ksize)],
                axis=0)
            outs.append(jnp.dot(w[g * cog:(g + 1) * cog, :], slab,
                                preferred_element_type=jnp.float32))
        acc = jnp.concatenate(outs, axis=0) if groups > 1 else outs[0]

    acc = acc + b_ref[...].astype(jnp.float32)     # one-pass epilogue
    o_ref[0] = acc.astype(o_ref.dtype)


def chunked_conv1d(x, weight, bias=None, *, stride=1, padding=0, dilation=1,
                   groups=1, tl=None, tco=None):
    """Equivalent of ChunkedConv1d.forward (== nn.Conv1d forward), via Pallas.

    x:      (B, C_in, L)
    weight: (C_out, C_in // groups, K)
    bias:   (C_out,) or None
    tl:     output-length tile (lanes, rounded to 128);  tco: C_out tile.
    """
    B, C_in, L = x.shape
    C_out, C_in_g, K = weight.shape
    s, d, p = int(stride), int(dilation), int(padding)
    assert C_in_g * groups == C_in and C_out % groups == 0
    assert s >= 1 and d >= 1 and K >= 1 and p >= 0
    L_out = (L + 2 * p - d * (K - 1) - 1) // s + 1
    assert L_out > 0
    itemsize = jnp.dtype(x.dtype).itemsize

    depthwise = (C_in_g == 1 and C_out == groups and groups == C_in)

    # ---- per-chip VMEM budget ----------------------------------------------
    try:
        vmem_cap = int(pltpu.get_tpu_info().vmem_capacity_bytes)
    except Exception:  # pragma: no cover - conservative (v7x-sized) fallback
        vmem_cap = 64 * 2 ** 20
    vmem_budget = (3 * vmem_cap) // 4          # headroom for Mosaic scratch

    # ---- halo geometry -------------------------------------------------------
    max_q = (d * (K - 1)) // s                 # tap reach past an output tile
    has_halo = max_q > 0
    halo_blk = _round_up(max_q, 128) if has_halo else 0

    # ---- L_out tiling (lane axis) --------------------------------------------
    if tl is None:
        default_tl = 1024 if vmem_budget >= 72 * 2 ** 20 else 512
        tl_eff = min(default_tl, _round_up(L_out, 128))
        # v7x has 2 TensorCores: avoid a single-step grid when B == 1.
        if B == 1 and L_out > 128 and tl_eff >= L_out:
            tl_eff = _round_up(-(-L_out // 2), 128)
    else:
        tl_eff = int(tl)
    tl_eff = _round_up(max(tl_eff, 128), 128)
    if has_halo:
        tl_eff = _round_up(tl_eff, halo_blk)   # halo block index stays exact
        ratio = tl_eff // halo_blk
    else:
        ratio = 1
    n_lt = -(-L_out // tl_eff)

    # ---- input layout --------------------------------------------------------
    # stride == 1: at most a zero-pad along L (zero copies when padding == 0).
    # stride  > 1: one-time phase de-interleave so every tap is a contiguous
    #              lane slice; per-phase channels padded to 8 sublanes for
    #              groups == 1 so tap slices stay (8,128)-tile aligned.
    if s == 1:
        c_pad = C_in
        x_in = jnp.pad(x, ((0, 0), (0, 0), (p, p))) if p > 0 else x
        lx = L + 2 * p
    else:
        lm = -(-(L + 2 * p) // s)
        total = s * lm
        x_flat = jnp.pad(x, ((0, 0), (0, 0), (p, total - p - L)))
        x4 = x_flat.reshape(B, C_in, lm, s).transpose(0, 3, 1, 2)   # (B,s,C,lm)
        if groups == 1 and C_in % 8 != 0:
            c_pad = _round_up(C_in, 8)
            x4 = jnp.pad(x4, ((0, 0), (0, 0), (0, c_pad - C_in), (0, 0)))
        else:
            c_pad = C_in
        x_in = x4.reshape(B, s * c_pad, lm)
        lx = lm
        assert s * lm >= L + 2 * p and L_out <= lm   # all needed taps in-bounds
    # TODO(synk): fuse the remaining pad / phase de-interleave into the kernel
    # (allow_input_fusion or masked edge tiles) to drop the stride>1 /
    # padding>0 HBM round trip of the activations.

    # ---- weight / bias re-layout: contraction (k, c_in) flat, lane-dense ------
    w_cols = K * (c_pad if groups == 1 else C_in_g)
    w2 = jnp.transpose(weight, (0, 2, 1))                 # (C_out, K, C_in_g)
    if groups == 1 and c_pad > C_in_g:
        w2 = jnp.pad(w2, ((0, 0), (0, 0), (0, c_pad - C_in_g)))
    w2 = w2.reshape(C_out, w_cols)
    if bias is None:
        bias = jnp.zeros((C_out,), x.dtype)
    b2 = bias.reshape(C_out, 1)

    # ---- C_out tiling ----------------------------------------------------------
    def _vmem_need(tco_rows, chan_rows):
        n = 2 * chan_rows * tl_eff * itemsize             # main window (2x buf)
        if has_halo:
            n += 2 * chan_rows * halo_blk * itemsize      # halo window (2x buf)
        n += 2 * tco_rows * (w_cols + 1) * itemsize       # weight + bias (2x)
        n += 2 * tco_rows * tl_eff * itemsize             # output tile (2x)
        n += 4 * tco_rows * tl_eff                        # f32 accumulator
        n += K * chan_rows * tl_eff * itemsize            # tap/slab temps (u.b.)
        return n

    if depthwise and s == 1:
        # Tile channels so the f32 accumulator stays vreg-resident.
        if tco is not None:
            tco_eff = min(int(tco), C_out)
        else:
            acc_cap = max(8, ((128 * 1024) // (4 * tl_eff)) // 8 * 8)
            tco_eff = min(C_out, acc_cap)
        if tco_eff < C_out:
            tco_eff = max(8, (tco_eff // 8) * 8)
        c_chan = tco_eff
        chan_block = tco_eff
    elif groups > 1:
        # Grouped (incl. depthwise with stride>1): keep all groups in one tile.
        # TODO(synk): tile channels for large stride>1 depthwise convs too.
        tco_eff = C_out
        c_chan = C_in
        chan_block = s * C_in
    else:
        c_chan = c_pad
        chan_block = s * c_pad
        if tco is not None:
            tco_eff = min(int(tco), C_out)
        else:
            # Prefer n_co == 1 (activations streamed from HBM exactly once).
            tco_eff = C_out
            while tco_eff > 8 and _vmem_need(tco_eff, chan_block) > vmem_budget:
                tco_eff = max(8, (tco_eff // 2 // 8) * 8)
        if tco_eff < C_out:
            tco_eff = max(8, (tco_eff // 8) * 8)
    n_co = -(-C_out // tco_eff)

    per_tap = (groups == 1) and (not depthwise) and (c_chan >= 256)

    need = _vmem_need(tco_eff, chan_block)
    vmem_limit = int(min(vmem_budget, max(32 * 2 ** 20, 2 * need)))

    # ---- BlockSpecs ------------------------------------------------------------
    if has_halo:
        last_hb = -(-lx // halo_blk) - 1   # clamp keeps the halo DMA in-bounds;
        # when a tile genuinely needs halo data, (lt+1)*ratio <= last_hb holds.

    if depthwise and s == 1:
        main_map = lambda b, lt, co: (b, co, lt)
        if has_halo:
            halo_map = lambda b, lt, co: (
                b, co, jnp.minimum((lt + 1) * ratio, last_hb))
    else:
        # Input block index is independent of `co`; with co innermost on the
        # grid the pipeline skips the re-DMA between consecutive co steps.
        main_map = lambda b, lt, co: (b, 0, lt)
        if has_halo:
            halo_map = lambda b, lt, co: (
                b, 0, jnp.minimum((lt + 1) * ratio, last_hb))

    in_specs = [pl.BlockSpec((1, chan_block, tl_eff), main_map)]
    args = [x_in]
    if has_halo:
        in_specs.append(pl.BlockSpec((1, chan_block, halo_blk), halo_map))
        args.append(x_in)
    in_specs.append(pl.BlockSpec((tco_eff, w_cols), lambda b, lt, co: (co, 0)))
    in_specs.append(pl.BlockSpec((tco_eff, 1), lambda b, lt, co: (co, 0)))
    args += [w2, b2]

    kernel = functools.partial(
        _conv1d_kernel, ksize=K, dilation=d, stride=s, groups=groups,
        c_chan=c_chan, c_in_g=C_in_g, has_halo=has_halo, depthwise=depthwise,
        per_tap=per_tap)

    flops = 2 * B * C_out * C_in_g * K * L_out
    bytes_accessed = int(x_in.size * itemsize
                         + B * n_lt * (w2.size + b2.size) * itemsize
                         + B * C_out * L_out * itemsize)

    # Output at its exact shape: partial trailing blocks are masked on
    # writeback -- no post-call slice / extra HBM round trip of the output.
    return pl.pallas_call(
        kernel,
        out_shape=jax.ShapeDtypeStruct((B, C_out, L_out), x.dtype),
        grid_spec=pltpu.PrefetchScalarGridSpec(
            num_scalar_prefetch=0,
            grid=(B, n_lt, n_co),
            in_specs=in_specs,
            out_specs=pl.BlockSpec((1, tco_eff, tl_eff),
                                   lambda b, lt, co: (b, co, lt)),
        ),
        compiler_params=pltpu.CompilerParams(
            dimension_semantics=("parallel", "parallel", "arbitrary"),
            vmem_limit_bytes=vmem_limit),
        cost_estimate=pl.CostEstimate(flops=flops, transcendentals=0,
                                      bytes_accessed=bytes_accessed),
    )(*args)


def _reference(x, w, b, stride, padding, dilation, groups):
    out = jax.lax.conv_general_dilated(
        x, w, window_strides=(stride,), padding=[(padding, padding)],
        rhs_dilation=(dilation,), dimension_numbers=("NCH", "OIH", "NCH"),
        feature_group_count=groups, precision=jax.lax.Precision.HIGHEST)
    return out + b[None, :, None]


if __name__ == "__main__":
    key = jax.random.PRNGKey(0)

    # Small configs exercising: base (padded), zero-copy (pad=0), stride+groups,
    # stride+dilation (+phase channel padding), multi L/C_out tiles with halo
    # and input reuse across co, and depthwise (VPU path).
    configs = [
        dict(c_in=4, c_out=8,  k=3, stride=1, padding=1, dilation=1, groups=1,
             b=2, l=16,  tl=None, tco=None),
        dict(c_in=4, c_out=8,  k=3, stride=1, padding=0, dilation=1, groups=1,
             b=2, l=20,  tl=None, tco=None),
        dict(c_in=4, c_out=6,  k=3, stride=2, padding=1, dilation=1, groups=2,
             b=2, l=19,  tl=None, tco=None),
        dict(c_in=4, c_out=8,  k=5, stride=3, padding=4, dilation=2, groups=1,
             b=2, l=33,  tl=None, tco=None),
        dict(c_in=4, c_out=16, k=3, stride=1, padding=1, dilation=1, groups=1,
             b=2, l=300, tl=128, tco=8),
        dict(c_in=8, c_out=8,  k=3, stride=1, padding=1, dilation=1, groups=8,
             b=2, l=64,  tl=None, tco=None),
    ]

    for i, cfg in enumerate(configs):
        key, kx, kw, kb = jax.random.split(key, 4)
        c_in_g = cfg["c_in"] // cfg["groups"]
        fan_in = c_in_g * cfg["k"]
        bound = 1.0 / (fan_in ** 0.5)

        x = jax.random.normal(kx, (cfg["b"], cfg["c_in"], cfg["l"]),
                              dtype=jnp.float32)
        w = jax.random.uniform(kw, (cfg["c_out"], c_in_g, cfg["k"]),
                               minval=-bound, maxval=bound, dtype=jnp.float32)
        b = jax.random.uniform(kb, (cfg["c_out"],),
                               minval=-bound, maxval=bound, dtype=jnp.float32)

        out = chunked_conv1d(x, w, b, stride=cfg["stride"],
                             padding=cfg["padding"], dilation=cfg["dilation"],
                             groups=cfg["groups"], tl=cfg["tl"], tco=cfg["tco"])
        out = jax.block_until_ready(out)

        ref = _reference(x, w, b, cfg["stride"], cfg["padding"],
                         cfg["dilation"], cfg["groups"])
        assert out.shape == ref.shape, (i, out.shape, ref.shape)
        err = float(jnp.max(jnp.abs(out - ref)))
        assert jnp.allclose(out, ref, atol=1e-4, rtol=1e-4), (i, err)

    print("KERNEL_OK")
</pallas_src>

<mosaic_0001>
module attributes {stable_mosaic.version = 11 : i64} {
  func.func @_conv1d_kernel(%arg0: i32, %arg1: i32, %arg2: i32, %arg3: memref<1x4x128xf32, #tpu.memory_space<vmem>>, %arg4: memref<1x4x128xf32, #tpu.memory_space<vmem>>, %arg5: memref<8x12xf32, #tpu.memory_space<vmem>>, %arg6: memref<8x1xf32, #tpu.memory_space<vmem>>, %arg7: memref<1x8x128xf32, #tpu.memory_space<vmem>>) attributes {dimension_semantics = [#tpu.dimension_semantics<parallel>, #tpu.dimension_semantics<parallel>, #tpu.dimension_semantics<arbitrary>], iteration_bounds = array<i64: 2, 1, 1>, scalar_prefetch = 0 : i64, scratch_operands = 0 : i64, tpu.core_type = #tpu.core_type<tc>, window_params = [{transform_indices = @transform_0, window_bounds = array<i64: 1, 4, 128>}, {transform_indices = @transform_1, window_bounds = array<i64: 1, 4, 128>}, {transform_indices = @transform_2, window_bounds = array<i64: 8, 12>}, {transform_indices = @transform_3, window_bounds = array<i64: 8, 1>}, {transform_indices = @transform_4, window_bounds = array<i64: 1, 8, 128>}]} {
    %c0 = arith.constant 0 : index
    %c0_0 = arith.constant 0 : index
    %c0_1 = arith.constant 0 : index
    %0 = vector.load %arg3[%c0, %c0_0, %c0_1] : memref<1x4x128xf32, #tpu.memory_space<vmem>>, vector<1x4x128xf32>
    %1 = vector.shape_cast %0 : vector<1x4x128xf32> to vector<4x128xf32>
    %c0_2 = arith.constant 0 : index
    %c0_3 = arith.constant 0 : index
    %c0_4 = arith.constant 0 : index
    %2 = vector.load %arg4[%c0_2, %c0_3, %c0_4] : memref<1x4x128xf32, #tpu.memory_space<vmem>>, vector<1x4x128xf32>
    %3 = vector.shape_cast %2 : vector<1x4x128xf32> to vector<4x128xf32>
    %c0_5 = arith.constant 0 : index
    %c0_6 = arith.constant 0 : index
    %4 = vector.load %arg5[%c0_5, %c0_6] : memref<8x12xf32, #tpu.memory_space<vmem>>, vector<8x12xf32>
    %5 = vector.extract_strided_slice %1 {offsets = [0, 1], sizes = [4, 127], strides = [1, 1]} : vector<4x128xf32> to vector<4x127xf32>
    %6 = vector.extract_strided_slice %3 {offsets = [0, 0], sizes = [4, 1], strides = [1, 1]} : vector<4x128xf32> to vector<4x1xf32>
    %7 = tpu.concatenate %5, %6 in 1 : vector<4x127xf32>, vector<4x1xf32> -> vector<4x128xf32>
    %8 = vector.extract_strided_slice %1 {offsets = [0, 2], sizes = [4, 126], strides = [1, 1]} : vector<4x128xf32> to vector<4x126xf32>
    %9 = vector.extract_strided_slice %3 {offsets = [0, 0], sizes = [4, 2], strides = [1, 1]} : vector<4x128xf32> to vector<4x2xf32>
    %10 = tpu.concatenate %8, %9 in 1 : vector<4x126xf32>, vector<4x2xf32> -> vector<4x128xf32>
    %11 = tpu.concatenate %1, %7, %10 in 0 : vector<4x128xf32>, vector<4x128xf32>, vector<4x128xf32> -> vector<12x128xf32>
    %cst = arith.constant dense<0.000000e+00> : vector<8x128xf32>
    %12 = tpu.matmul %4, %11, %cst {dimension_numbers = #tpu.dot_dimension_numbers<[1], [0], [0], [1], [0, 0, 1, 1], [], []>} : vector<8x12xf32>, vector<12x128xf32>, vector<8x128xf32> -> vector<8x128xf32>
    %c0_7 = arith.constant 0 : index
    %c0_8 = arith.constant 0 : index
    %13 = vector.load %arg6[%c0_7, %c0_8] : memref<8x1xf32, #tpu.memory_space<vmem>>, vector<8x1xf32>
    %14 = vector.broadcast %13 : vector<8x1xf32> to vector<8x128xf32>
    %15 = arith.addf %12, %14 : vector<8x128xf32>
    %c0_9 = arith.constant 0 : index
    %c0_10 = arith.constant 0 : index
    %c0_11 = arith.constant 0 : index
    %16 = vector.load %arg7[%c0_9, %c0_10, %c0_11] : memref<1x8x128xf32, #tpu.memory_space<vmem>>, vector<1x8x128xf32>
    %17 = vector.shape_cast %16 : vector<1x8x128xf32> to vector<8x128xf32>
    %18 = vector.shape_cast %15 : vector<8x128xf32> to vector<1x8x128xf32>
    tpu.vector_store %arg7[%c0_9, %c0_10, %c0_11], %18 {strides = array<i32>} : memref<1x8x128xf32, #tpu.memory_space<vmem>>, vector<1x8x128xf32>,
    return
  }
  func.func @transform_0(%arg0: i32, %arg1: i32, %arg2: i32) -> (i32, i32, i32) {
    %c0_i32 = arith.constant 0 : i32
    %c0_i32_0 = arith.constant 0 : i32
    return %arg0, %c0_i32, %arg1 : i32, i32, i32
  }
  func.func @transform_1(%arg0: i32, %arg1: i32, %arg2: i32) -> (i32, i32, i32) {
    %c1_i32 = arith.constant 1 : i32
    %0 = arith.addi %arg1, %c1_i32 : i32
    %c1_i32_0 = arith.constant 1 : i32
    %1 = arith.muli %0, %c1_i32_0 : i32
    %c0_i32 = arith.constant 0 : i32
    %2 = arith.minsi %1, %c0_i32 : i32
    %c0_i32_1 = arith.constant 0 : i32
    %c0_i32_2 = arith.constant 0 : i32
    return %arg0, %c0_i32_1, %2 : i32, i32, i32
  }
  func.func @transform_2(%arg0: i32, %arg1: i32, %arg2: i32) -> (i32, i32) {
    %c0_i32 = arith.constant 0 : i32
    %c0_i32_0 = arith.constant 0 : i32
    return %arg2, %c0_i32 : i32, i32
  }
  func.func @transform_3(%arg0: i32, %arg1: i32, %arg2: i32) -> (i32, i32) {
    %c0_i32 = arith.constant 0 : i32
    %c0_i32_0 = arith.constant 0 : i32
    return %arg2, %c0_i32 : i32, i32
  }
  func.func @transform_4(%arg0: i32, %arg1: i32, %arg2: i32) -> (i32, i32, i32) {
    %c0_i32 = arith.constant 0 : i32
    return %arg0, %arg2, %arg1 : i32, i32, i32
  }
}

</mosaic_0001>

<bundles_post_ra>
// kernel: tpu_custom_call.1
= control target key start
LH: loop header
LB: loop body
LE: loop exit
PB: predicated region body
PF: predicated region fallthrough
CT: control target
= control target key end

     0   :  { %9 = vsyncpa [#allocation3], 0  ;;  %s961_s0 = inlined_call_operand.vmem [shape: f32[2,4,18], index: 0, kind: input, shape index: {}]   ;;  %s962_s1 = inlined_call_operand.hbm [shape: f32[2,4,18], index: 1, kind: input, shape index: {}]   ;;  %s963_s2 = inlined_call_operand.hbm [shape: f32[8,12], index: 2, kind: input, shape index: {}]   ;;  %s964_s3 = inlined_call_operand.vmem [shape: f32[8,1], index: 3, kind: input, shape index: {}]   ;;  %s965_s4 = inlined_call_operand.hbm [shape: f32[2,8,16], index: 4, kind: output, shape index: {}]  }
   0x1   :  { %11 = vsyncpa [#allocation3 + $0x1], 0 }
   0x2   :  { %12 = vsyncpa [#allocation6], 0 }
   0x3   :  { %13 = vsyncpa [#allocation4], 0 }
   0x4   :  { %15 = vsyncpa [#allocation4 + $0x1], 0  ;;  %s803_s15 = smov 0   ;;  %s805_s16 = smov 0  }
   0x5   :  { %s807_s17 = smov 0   ;;  %s809_s18 = smov 0  }
   0x6   :  { %s811_s19 = smov 0   ;;  %s813_s20 = smov 0  }
   0x7 LB: > { %s524_s21 = sadd.s32 4294967295, %s772_s20   ;;  %s525_s22 = sadd.s32 4294967294, %s772_s20   ;;  %s772_s20 = sphi %s813_s20, %s21_s20   ;;  %s768_s19 = sphi %s811_s19, %s977_s19   ;;  %s764_s18 = sphi %s809_s18, %s976_s18   ;;  %s760_s17 = sphi %s807_s17, %s975_s17   ;;  %s756_s16 = sphi %s805_s16, %s974_s16   ;;  %s752_s15 = sphi %s803_s15, %s973_s15  }
   0x8   : > { %p96_p0 = scmp.ne.s32.totalorder %s756_s16, %s752_s15  ;;  %p837_p1 = scmp.eq.s32.totalorder %s524_s21, 0 }
   0x9   : > { %p841_p2 = scmp.eq.s32.totalorder %s524_s21, 1  ;;  %p182_p3 = scmp.eq.s32.totalorder %s525_s22, 1 }
   0xa   : > { %p847_p4 = por %p837_p1, %p96_p0  ;;  %p526_p5 = scmp.ge.s32.totalorder %s772_s20, 1 }
   0xb   : > { %p852_p6 = por %p182_p3, %p96_p0  ;;  %p189_p7 = scmp.lt.s32.totalorder %s772_s20, 3 }
   0xc   : > { %s203_s29 = sshll.u32 %s963_s2, 4  ;;  %p529_p9 = scmp.ge.s32.totalorder %s772_s20, 2  ;;  %s204_s29 = int_to_ptr.hbm [resolvable:$true] %s203_s29 }
   0xd   : > { %p860_p8 = pnand %p526_p5, %p189_p7  ;;  %s774_s5 = smov [#allocation5]  }
   0xe   : > { %s205_s6 = sshll.u32 %s774_s5, 4  ;;  %s40_s7 = sadd.s32 1, %s768_s19  ;;  %s206_s6 = int_to_ptr.vmem [resolvable:$true] %s205_s6 }
   0xf   : > { %p551_p10 = pneg %p860_p8  ;;  %p42_p12 = scmp.ge.s32.totalorder %s40_s7, 2 }
  0x10   : > { %s83_s8 = sadd.s32 1, %s760_s17  ;;  %p90_p13 = scmp.ne.s32.totalorder %s760_s17, %s756_s16 }
  0x11   : > { %p552_p11 = pnand %p551_p10, %p837_p1  ;;  %p91_p0 = scmp.eq.s32.totalorder %s772_s20, 0 }
  0x12   : > { %s979_s7 = smov (%p42_p12, %s40_s7), 0  ;;  %p882_p5 = por %p841_p2, %p90_p13 }
  0x13   : > { %554 = dma.hbm_to_vmem [thread:$0]  (!%p552_p11), %s204_s29, 128, %s206_s6, [#allocation6]  }
  0x14   : > { %p876_p3 = por %p91_p0, %p90_p13  ;;  %s78_s11 = ssub.s32 %s768_s19, %s979_s7 }
  0x15   : > { %p564_p7 = scmp.lt.s32.totalorder %s772_s20, 2  ;;  %p81_p10 = scmp.eq.s32.totalorder %s78_s11, 0 }
  0x16   : > { %s233_s12 = sand.u32 1, %s760_s17   ;;  %s531_s21 = sshll.u32 %s768_s19, 2 }
  0x17   : > { %s530_s13 = sshll.u32 %s233_s12, 2  ;;  %s245_s28 = scalar_lea.hbm %s962_s1, %s531_s21 }
  0x18   : > { %s891_s14 = scalar_select %p81_p10, %s760_s17, %s83_s8  }
  0x19   : > { %s237_s29 = scalar_lea.vmem [#allocation2], %s530_s13  ;;  %s247_s24 = sshll.u32 %s245_s28, 4  ;;  %s248_s24 = int_to_ptr.hbm [resolvable:$true] %s247_s24 }
  0x1a   : > { %s249_s5 = sshll.u32 %s237_s29, 4  ;;  %p556_p2 = pnand %p564_p7, %p876_p3  ;;  %s250_s5 = int_to_ptr.vmem [resolvable:$true] %s249_s5 }
  0x1b   : > { %s234_s6 = scalar_lea.sflag [#allocation3], %s233_s12  ;;  %258 = sbr.rel (%p860_p8) target bundleno = 302 (0x12e), region = 36 }
  0x1c   : > { %558 = dma.hbm_to_vmem [thread:$0]  (!%p556_p2), %s248_s24, 64, %s250_s5, %s234_s6  }
  0x1d   : > { %s902_s8 = sand.u32 (!%p860_p8), 1, %s756_s16  }
  0x1e   : > { %s533_s11 = sshll.u32 (!%p860_p8), %s902_s8, 2  ;;  %s261_s21 = scalar_lea.sflag (!%p860_p8), [#allocation3], %s902_s8 }
  0x1f   : > { %s264_s13 = scalar_lea.vmem (!%p860_p8), [#allocation2], %s533_s11 }
  0x20   : > { %739 = dma.done.wait (%p847_p4), %s261_s21, 64  }
  0x21   : > { %741 = vsyncadd (%p847_p4), %s261_s21, 4294967232 }
  0x22   : > { %743 = dma.done.wait (%p837_p1), [#allocation6], 128  }
  0x23   : > { %745 = vsyncadd (%p837_p1), [#allocation6], 4294967168  ;;  %p306_p8 = scmp.lt.s32.totalorder %s764_s18, 1  ;;  %v321_v1 = vld [vmem:[%s264_s13] sm:$0xf]  ;;  %s775_s25 = smov 126  }
  0x24   : > { %336 = vrot.lane.b32.xlu1 %v321_v1, %s775_s25  ;;  %s776_s28 = smov 127   ;;  %v346_v3 = vld [vmem:[%s964_s3] sm:$0xff]  ;;  %v777_v4 = vmov 0   ;;  %vm331_vm0 = vcmask 1039360   ;;  %vm339_vm1 = vcmask 1031168   ;;  %vm344_vm2 = vcmask 1043456  }
  0x25   : > { %s307_s30 = scalar_select %p306_p8, %s764_s18, 1  ;;  %624 = vset.pattern.permute.xlu1 %v777_v4  ;;  %625 = vset.pattern.permute.xlu0 %v777_v4  ;;  %v322_v13 = vld [vmem:[#allocation5] sm:$0xff]  ;;  %vm352_vm3 = vcmask 97280  }
  0x26   : > { %s535_s5 = sshll.u32 %s902_s8, 3  ;;  %s540_s24 = sshll.u32 %s764_s18, 3 }
  0x27   : > { %s536_s9 = sshll.u32 %s307_s30, 2  ;;  %s393_s21 = scalar_lea.hbm %s965_s4, %s540_s24 }
  0x28   : > { %s312_s27 = scalar_lea.vmem %s961_s0, %s536_s9  ;;  %s305_s13 = scalar_lea.vmem [#allocation7], %s535_s5 }
  0x29   : > { %v320_v0 = vld [vmem:[%s312_s27] sm:$0xf]  ;;  %s395_s30 = sshll.u32 %s305_s13, 4  ;;  %s397_s9 = sshll.u32 %s393_s21, 4  ;;  %s396_s30 = int_to_ptr.vmem [resolvable:$true] %s395_s30  ;;  %s398_s9 = int_to_ptr.hbm [resolvable:$true] %s397_s9 }
  0x2a   : > { %v619_v2 = vpack.i.bf16 %v321_v1, %v320_v0  ;;  %s381_s12 = scalar_lea.sflag [#allocation4], %s902_s8  ;;  %s700_s22 = sshra.s32 %s398_s9, 4  ;;  %s701_s22 = int_to_ptr.hbm [resolvable:$true] %s700_s22 }
  0x2b   : > { %s702_s27 = scalar_lea.hbm %s701_s22, 8  ;;  %p707_p12 = scmp.lt.s32.totalorder %s701_s22, %s965_s4 }
  0x2c   : > { %620 = vrot.lane.b32.xlu0 %v619_v2, %s776_s28  ;;  %349 = vperm.xlu1 %624, %v346_v3   ;;  %p703_p1 = scmp.ne.s32.totalorder %s701_s22, %s702_s27  ;;  %s706_s28 = scalar_lea.hbm %s965_s4, 16 }
  0x2d   : > { %p708_p13 = scmp.lt.s32.totalorder %s706_s28, %s702_s27 }
  0x2e   : > { %p704_p4 = pnand %p703_p1, %p882_p5 }
  0x2f   : > { %p709_p0 = por %p708_p13, %p707_p12 }
  0x30   : > { %p705_p11 = pneg %p704_p4 }
  0x32   : > { %p710_p3 = pnand %p709_p0, %p705_p11 }
  0x34   : > { %333 = vrot.lane.b32.xlu0 %v320_v0, %s775_s25 }
  0x96   : > { %v337_v9 = vpop.permute.xlu1 %336 }
  0x9e   : > { %v621_v5 = vpop.permute.xlu0 %620  ;;  %v350_v15 = vpop.permute.xlu1 %349 }
  0x9f   : > { %v623_v6 = vunpack.i.h.bf16 %v621_v5  ;;  %v622_v7 = vunpack.i.l.bf16 %v621_v5 }
  0xa1   : > { %v332_v8 = vsel %vm331_vm0, %v622_v7, %v623_v6 }
  0xa2   : > { %v342_v10 = vrot.slane %v332_v8, 4 }
  0xa4   : > { %v345_v14 = vsel %vm344_vm2, %v320_v0, %v342_v10 }
  0xa6   : > { %v334_v11 = vpop.permute.xlu0 %333 }
  0xa7   : > { %v340_v12 = vsel %vm339_vm1, %v334_v11, %v337_v9 }
  0xa8   : > { %537 = vmatpush.msk.msra.mxu0 %vm344_vm2, %v340_v12 }
  0xaa   : > { %374 = vmatpush.msra.mxu0 %v345_v14 }
  0xab   : > { %538 = vmatmul.msk.f32.vlgmr.msra.gmra.mxu0 %vm352_vm3, %v322_v13 }
 0x128   : > { %v376_v16 = vpop.f32.mrf.mxu0 }
 0x129   : > { %v377_v17 = vadd.f32 %v376_v16, %v350_v15 }
 0x12b   : > { %379 = vst [vmem:[%s305_s13] sm:$0xff] %v377_v17 }
 0x12c   : > { %713 = shalt.err (!%p710_p3)
}
 0x12d   : > { %549 = dma.vmem_to_hbm [thread:$0]  (%p882_p5), %s396_s30, 128, %s398_s9, %s381_s12  }
 0x12e PF: > { %s409_s8 = sand.u32 1, %s752_s15   ;;  %p560_p7 = pnand %p529_p9, %p852_p6 }
 0x12f   : > { %s410_s5 = scalar_lea.sflag [#allocation4], %s409_s8 }
 0x130   : > { %p561_p10 = pneg %p560_p7 }
 0x132   : > { %747 = dma.done.wait (%p561_p10), %s410_s5, 128  }
 0x133   : > { %749 = vsyncadd (%p561_p10), %s410_s5, 4294967168  ;;  %s21_s20 = sadd.s32 1, %s772_s20   ;;  %s973_s15 = smov %s756_s16 }
 0x134   : > { %p18_p2 = scmp.ge.s32.totalorder %s21_s20, 4   ;;  %s974_s16 = smov %s760_s17 }
 0x135   : > { %s975_s17 = smov %s891_s14  ;;  %s976_s18 = smov %s768_s19 }
 0x136   : > { %s977_s19 = smov %s979_s7  ;;  %20 = sbr.rel (!%p18_p2) target bundleno = 7 (0x7), region = 92 }
 0x13b   :  { %416 = vsyncpa [#allocation3], 1 }
 0x13c   :  { %418 = vsyncpa [#allocation3 + $0x1], 1 }
 0x13d   :  { %419 = vsyncpa [#allocation6], 1 }
 0x13e   :  { %420 = vsyncpa [#allocation4], 1 }
 0x13f   :  { %422 = vsyncpa [#allocation4 + $0x1], 1 }

</bundles_post_ra>
